<compile_context>
chip_gen: v7x
topology: tpu7x:2x2x1
jax: 0.10.0
libtpu: 0.0.40
codegen_flags: <defaults>
</compile_context>

<pallas_src>
import math

import jax
import jax.numpy as jnp
from jax.experimental import pallas as pl
from jax.experimental.pallas import tpu as pltpu


_LANE = 128
_MAX_COLS = 2048                    # lane-dense slab / block width target
_MAX_TILE_BYTES = 2 * 1024 * 1024   # <=2 MiB per tile -> <=8 MiB double-buffered in+out


def _copy_kernel(x_ref, o_ref):
    # Pure lane/sublane-dense 2D tile copy; the flatten is done by free wrapper reshapes.
    o_ref[...] = x_ref[...]


def _sublane_align(dtype):
    # Sub-32-bit dtypes pack along sublanes: 8 rows f32, 16 bf16, 32 int8/fp8.
    return max(8, 32 // jnp.dtype(dtype).itemsize)


def _round_up(x, m):
    return ((x + m - 1) // m) * m


def _pick_slab(n, flat):
    """Reshape target (rows, cols) for the contiguous buffer, decoupled from (n, flat).

    Picks the largest multiple of 128 (<= _MAX_COLS) that divides the total element
    count so every tile is lane-dense regardless of how small the batch dim is.
    """
    total = n * flat
    if total % _LANE == 0:
        cols = _LANE
        c = _MAX_COLS
        while c >= _LANE:
            if total % c == 0:
                cols = c
                break
            c -= _LANE
        return total // cols, cols
    # No 128-divisible packing exists: fall back to the logical view.
    return n, flat


def _pick_blocks(rows, cols, dtype):
    itemsize = jnp.dtype(dtype).itemsize
    sub = _sublane_align(dtype)

    # Lane (last) block dim: a multiple of 128, or the full dim; never the raw huge dim.
    if cols % _LANE == 0:
        bn = min(cols, _MAX_COLS)
    elif cols <= _MAX_COLS:
        bn = cols                      # full dim is always legal
    else:
        bn = _MAX_COLS                 # 128-aligned; pl.cdiv masks the ragged tail

    # Sublane block dim: dtype-aligned, capped so one tile stays <= ~2 MiB.
    bm_cap = max(sub, (_MAX_TILE_BYTES // (bn * itemsize)) // sub * sub)
    bm = min(_round_up(rows, sub), bm_cap)

    # v7x megacore: keep >= 2 steps on a parallel axis when the data is big enough
    # to be worth splitting across the two TensorCores.
    if -(-rows // bm) == 1 and -(-cols // bn) == 1 and rows >= 2 * sub:
        bm = max(sub, _round_up(-(-rows // 2), sub))

    return bm, bn


def flatten_layer(x):
    """Pallas equivalent of FlattenLayer.forward: x.view(x.shape[0], -1)."""
    # TODO(synk): in a real model, delete this kernel entirely — a contiguous
    # NCHW -> (N, C*H*W) flatten is a free metadata reshape (x.reshape(n, -1)),
    # or fuse the flatten into the neighboring kernel's BlockSpec index_map.
    n = x.shape[0]
    flat = math.prod(x.shape[1:])

    rows, cols = _pick_slab(n, flat)
    bm, bn = _pick_blocks(rows, cols, x.dtype)
    grid = (pl.cdiv(rows, bm), pl.cdiv(cols, bn))

    # Contiguous row-major reshapes are metadata-only: present the kernel with a
    # lane/sublane-dense slab, reshape the result back to (n, flat) for free.
    x2 = x.reshape(rows, cols)
    itemsize = jnp.dtype(x.dtype).itemsize

    call = pl.pallas_call(
        _copy_kernel,
        out_shape=jax.ShapeDtypeStruct((rows, cols), x.dtype),
        grid_spec=pl.GridSpec(
            grid=grid,
            in_specs=[pl.BlockSpec((bm, bn), lambda i, j: (i, j))],
            out_specs=pl.BlockSpec((bm, bn), lambda i, j: (i, j)),
        ),
        compiler_params=pltpu.CompilerParams(
            dimension_semantics=("parallel", "parallel"),
        ),
        cost_estimate=pl.CostEstimate(
            flops=0,
            transcendentals=0,
            bytes_accessed=2 * rows * cols * itemsize,
        ),
        # Same shape/dtype in and out: let the result reuse the input HBM buffer.
        input_output_aliases={0: 0},
    )
    y2 = jax.jit(call, donate_argnums=0)(x2)
    return y2.reshape(n, flat)


if __name__ == "__main__":
    key = jax.random.PRNGKey(0)
    x = jax.random.normal(key, (2, 4, 16, 16), dtype=jnp.float32)

    # Reference (same semantics as torch .view(N, -1)); computed before the kernel.
    y_ref = x.reshape(x.shape[0], -1)

    y = flatten_layer(x)
    y = jax.block_until_ready(y)

    assert y.shape == (2, 4 * 16 * 16), y.shape
    assert jnp.array_equal(y, y_ref), "mismatch vs reference reshape"

    print("KERNEL_OK")
</pallas_src>

<mosaic_0001>
module attributes {stable_mosaic.version = 11 : i64} {
  func.func @_copy_kernel(%arg0: i32, %arg1: i32, %arg2: memref<8x2048xf32, #tpu.memory_space<vmem>>, %arg3: memref<8x2048xf32, #tpu.memory_space<vmem>>) attributes {dimension_semantics = [#tpu.dimension_semantics<parallel>, #tpu.dimension_semantics<parallel>], iteration_bounds = array<i64: 1, 1>, scalar_prefetch = 0 : i64, scratch_operands = 0 : i64, tpu.core_type = #tpu.core_type<tc>, window_params = [{transform_indices = @transform_0, window_bounds = array<i64: 8, 2048>}, {transform_indices = @transform_1, window_bounds = array<i64: 8, 2048>}]} {
    %c0 = arith.constant 0 : index
    %c0_0 = arith.constant 0 : index
    %0 = vector.load %arg2[%c0, %c0_0] : memref<8x2048xf32, #tpu.memory_space<vmem>>, vector<8x2048xf32>
    %c0_1 = arith.constant 0 : index
    %c0_2 = arith.constant 0 : index
    %1 = vector.load %arg3[%c0_1, %c0_2] : memref<8x2048xf32, #tpu.memory_space<vmem>>, vector<8x2048xf32>
    tpu.vector_store %arg3[%c0_1, %c0_2], %0 {strides = array<i32>} : memref<8x2048xf32, #tpu.memory_space<vmem>>, vector<8x2048xf32>,
    return
  }
  func.func @transform_0(%arg0: i32, %arg1: i32) -> (i32, i32) {
    %c0_i32 = arith.constant 0 : i32
    return %arg0, %arg1 : i32, i32
  }
  func.func @transform_1(%arg0: i32, %arg1: i32) -> (i32, i32) {
    %c0_i32 = arith.constant 0 : i32
    return %arg0, %arg1 : i32, i32
  }
}

</mosaic_0001>

<bundles_post_ra>
// kernel: tpu_custom_call.1
= control target key start
LH: loop header
LB: loop body
LE: loop exit
PB: predicated region body
PF: predicated region fallthrough
CT: control target
= control target key end

     0   :  { %6 = vsyncpa [#allocation3], 0  ;;  %s168_s0 = inlined_call_operand.hbm [shape: f32[1,2048], index: 0, kind: input, shape index: {}, may-alias: {0,1}]   ;;  %s169_s1 = inlined_call_operand.hbm [shape: f32[1,2048], index: 1, kind: output, shape index: {}, may-alias: {0,1}]  }
   0x1   :  { %7 = vsyncpa [#allocation4], 0 }
   0x2   :  { %12 = vsyncadd [#allocation3], 1792  ;;  %s124_s6 = smov [#allocation2]   ;;  %s76_s10 = scalar_lea.hbm %s168_s0, 256 }
   0x3   :  { %s13_s7 = sshll.u32 %s124_s6, 4  ;;  %p77_p0 = scmp.ne.s32.totalorder %s168_s0, %s76_s10  ;;  %s14_s7 = int_to_ptr.vmem [resolvable:$true] %s13_s7 }
   0x4   :  { %p80_p1 = scmp.lt.u32.totalorder %s76_s10, %s168_s0 }
   0x6   :  { %p82_p2 = pnand %p80_p1, %p77_p0 }
   0x8   :  { %85 = shalt.err (!%p82_p2)
}
   0x9   :  { %s86_s15 = scalar_lea.vmem %s14_s7, 256  ;;  %s90_s16 = scalar_lea.vmem %s14_s7, 2048 }
   0xa   :  { %p87_p3 = scmp.ne.s32.totalorder %s14_s7, %s86_s15  ;;  %p91_p4 = scmp.lt.s32.totalorder %s14_s7, %s14_s7 }
   0xb   :  { %p92_p5 = scmp.lt.s32.totalorder %s90_s16, %s86_s15 }
   0xd   :  { %p93_p6 = por %p92_p5, %p91_p4 }
   0xf   :  { %p94_p7 = pnand %p93_p6, %p87_p3 }
  0x11   :  { %97 = shalt.err (!%p94_p7)
}
  0x12   :  { %s125_s17 = smov 256   ;;  %s126_s18 = smov 16  }
  0x13   :  { %19 = dma.hbm_to_vmem [thread:$0]  %s168_s0, 256, %s14_s7, [#allocation3], %s125_s17, %s125_s17, %s126_s18  }
  0x14   :  { %120 = dma.done.wait [#allocation3], 2048  }
  0x15   :  { %121 = vsyncadd [#allocation3], 4294965248  ;;  %v23_v0 = vld [vmem:[#allocation2] sm:$0xff]  ;;  %v24_v1 = vld [vmem:[#allocation2 + $0x8] sm:$0xff] }
  0x16   :  { %v25_v2 = vld [vmem:[#allocation2 + $0x10] sm:$0xff]  ;;  %39 = vst [vmem:[#allocation5] sm:$0xff] %v23_v0  ;;  %40 = vst [vmem:[#allocation5 + $0x8] sm:$0xff] %v24_v1  ;;  %v26_v3 = vld [vmem:[#allocation2 + $0x18] sm:$0xff] }
  0x17   :  { %41 = vst [vmem:[#allocation5 + $0x10] sm:$0xff] %v25_v2  ;;  %v27_v4 = vld [vmem:[#allocation2 + $0x20] sm:$0xff]  ;;  %v28_v5 = vld [vmem:[#allocation2 + $0x28] sm:$0xff]  ;;  %42 = vst [vmem:[#allocation5 + $0x18] sm:$0xff] %v26_v3 }
  0x18   :  { %43 = vst [vmem:[#allocation5 + $0x20] sm:$0xff] %v27_v4  ;;  %44 = vst [vmem:[#allocation5 + $0x28] sm:$0xff] %v28_v5  ;;  %v29_v6 = vld [vmem:[#allocation2 + $0x30] sm:$0xff]  ;;  %v30_v7 = vld [vmem:[#allocation2 + $0x38] sm:$0xff] }
  0x19   :  { %v31_v8 = vld [vmem:[#allocation2 + $0x40] sm:$0xff]  ;;  %45 = vst [vmem:[#allocation5 + $0x30] sm:$0xff] %v29_v6  ;;  %46 = vst [vmem:[#allocation5 + $0x38] sm:$0xff] %v30_v7  ;;  %v32_v9 = vld [vmem:[#allocation2 + $0x48] sm:$0xff] }
  0x1a   :  { %47 = vst [vmem:[#allocation5 + $0x40] sm:$0xff] %v31_v8  ;;  %v33_v10 = vld [vmem:[#allocation2 + $0x50] sm:$0xff]  ;;  %v34_v11 = vld [vmem:[#allocation2 + $0x58] sm:$0xff]  ;;  %48 = vst [vmem:[#allocation5 + $0x48] sm:$0xff] %v32_v9 }
  0x1b   :  { %49 = vst [vmem:[#allocation5 + $0x50] sm:$0xff] %v33_v10  ;;  %50 = vst [vmem:[#allocation5 + $0x58] sm:$0xff] %v34_v11  ;;  %v35_v12 = vld [vmem:[#allocation2 + $0x60] sm:$0xff]  ;;  %v36_v13 = vld [vmem:[#allocation2 + $0x68] sm:$0xff] }
  0x1c   :  { %v37_v14 = vld [vmem:[#allocation2 + $0x70] sm:$0xff]  ;;  %51 = vst [vmem:[#allocation5 + $0x60] sm:$0xff] %v35_v12  ;;  %52 = vst [vmem:[#allocation5 + $0x68] sm:$0xff] %v36_v13  ;;  %v38_v15 = vld [vmem:[#allocation2 + $0x78] sm:$0xff] }
  0x1d   :  { %53 = vst [vmem:[#allocation5 + $0x70] sm:$0xff] %v37_v14  ;;  %54 = vst [vmem:[#allocation5 + $0x78] sm:$0xff] %v38_v15 }
  0x1e   :  { %59 = vsyncadd [#allocation4], 1792  ;;  %s127_s0 = smov [#allocation5]  }
  0x1f   :  { %s60_s21 = sshll.u32 %s127_s0, 4  ;;  %s61_s21 = int_to_ptr.vmem [resolvable:$true] %s60_s21 }
  0x20   :  { %s98_s22 = scalar_lea.vmem %s61_s21, 256  ;;  %s102_s23 = scalar_lea.vmem %s61_s21, 2048 }
  0x21   :  { %p99_p8 = scmp.ne.s32.totalorder %s61_s21, %s98_s22  ;;  %p103_p9 = scmp.lt.s32.totalorder %s61_s21, %s61_s21 }
  0x22   :  { %p104_p10 = scmp.lt.s32.totalorder %s102_s23, %s98_s22 }
  0x24   :  { %p105_p11 = por %p104_p10, %p103_p9 }
  0x26   :  { %p106_p12 = pnand %p105_p11, %p99_p8 }
  0x28   :  { %109 = shalt.err (!%p106_p12)
}
  0x29   :  { %s110_s26 = scalar_lea.hbm %s169_s1, 256 }
  0x2a   :  { %p111_p13 = scmp.ne.s32.totalorder %s169_s1, %s110_s26  ;;  %p114_p0 = scmp.lt.u32.totalorder %s110_s26, %s169_s1 }
  0x2c   :  { %p116_p1 = pnand %p114_p0, %p111_p13 }
  0x2e   :  { %119 = shalt.err (!%p116_p1)
}
  0x2f   :  { %66 = dma.vmem_to_hbm [thread:$0]  %s61_s21, 256, %s169_s1, [#allocation4], %s125_s17, %s125_s17, %s126_s18  }
  0x30   :  { %122 = dma.done.wait [#allocation4], 2048  }
  0x31   :  { %123 = vsyncadd [#allocation4], 4294965248 }
  0x32   :  { %70 = vsyncpa [#allocation3], 1 }
  0x33   :  { %71 = vsyncpa [#allocation4], 1 }

</bundles_post_ra>
